<compile_context>
chip_gen: v7x
topology: tpu7x:2x2x1
jax: 0.10.0
libtpu: 0.0.40
codegen_flags: <defaults>
</compile_context>

<pallas_src>
import numpy as np

import jax
import jax.numpy as jnp
from jax.experimental import pallas as pl
from jax.experimental.pallas import tpu as pltpu


def _get_gradient_kernel(x_ref, dv_ref, dh_ref, o_ref):
    """x_ref/o_ref: (bt, H, W); dv_ref: (H, H); dh_ref: (W, W)."""
    dv = dv_ref[...]                       # vertical first-difference operator
    dh = dh_ref[...]                       # horizontal first-difference operator
    bt = x_ref.shape[0]
    for p in range(bt):                    # static unroll (bt <= 8)
        x = x_ref[p]                       # (H, W): H on sublanes, W on lanes
        v = jnp.dot(dv, x, preferred_element_type=jnp.float32)   # x[i+1]-x[i-1]
        h = jnp.dot(x, dh, preferred_element_type=jnp.float32)   # x[j+1]-x[j-1]
        o_ref[p] = jnp.sqrt(v * v + h * h + 1e-6).astype(o_ref.dtype)


def _difference_operators(H, W, dtype):
    # dv[i, k] = +1 if k == i+1, -1 if k == i-1  ->  (dv @ x)[i]    = x[i+1] - x[i-1]
    dv = np.zeros((H, H), dtype=dtype)
    i = np.arange(H - 1)
    dv[i, i + 1] = 1.0
    dv[i + 1, i] = -1.0
    # dh[k, j] = +1 if k == j+1, -1 if k == j-1  ->  (x @ dh)[:, j] = x[:, j+1] - x[:, j-1]
    dh = np.zeros((W, W), dtype=dtype)
    j = np.arange(W - 1)
    dh[j + 1, j] = 1.0
    dh[j, j + 1] = -1.0
    return jnp.asarray(dv), jnp.asarray(dh)


def get_gradient(x):
    """x: (N, C, H, W) -> (N, C, H, W) per-channel gradient magnitude."""
    N, C, H, W = x.shape
    P = N * C                                  # independent channel planes
    itemsize = x.dtype.itemsize
    plane_bytes = H * W * itemsize

    # Pack several planes per grid step so each step moves a decent block,
    # but keep >= 2 grid steps so both TensorCores get work on v7x.
    target_block = 2 << 20
    if plane_bytes >= target_block or P < 2:
        bt = 1
    else:
        bt_cap = max(1, min(8, target_block // plane_bytes, P // 2))
        bt = 1
        for cand in range(bt_cap, 0, -1):
            if P % cand == 0:
                bt = cand
                break
    block_bytes = bt * plane_bytes

    dv, dh = _difference_operators(H, W, x.dtype)
    xp = x.reshape(P, H, W)                    # free, contiguous relayout

    op_bytes = (H * H + W * W) * itemsize
    # in + out double-buffered, operators, plus slack; capped for v7x's 64 MiB VMEM.
    vmem_limit = 4 * block_bytes + 4 * op_bytes + (4 << 20)
    vmem_limit = int(min(48 << 20, max(16 << 20, vmem_limit)))

    cost = pl.CostEstimate(
        flops=2 * P * H * W * (H + W) + 6 * P * H * W,
        transcendentals=P * H * W,
        bytes_accessed=2 * P * H * W * itemsize + op_bytes,
    )

    out = pl.pallas_call(
        _get_gradient_kernel,
        out_shape=jax.ShapeDtypeStruct((P, H, W), x.dtype),
        grid=(P // bt,),
        in_specs=[
            pl.BlockSpec((bt, H, W), lambda n: (n, 0, 0)),
            pl.BlockSpec((H, H), lambda n: (0, 0)),   # constant block: fetched once
            pl.BlockSpec((W, W), lambda n: (0, 0)),   # constant block: fetched once
        ],
        out_specs=pl.BlockSpec((bt, H, W), lambda n: (n, 0, 0)),
        compiler_params=pltpu.CompilerParams(
            dimension_semantics=("parallel",),
            vmem_limit_bytes=vmem_limit,
        ),
        cost_estimate=cost,
    )(xp, dv, dh)
    return out.reshape(N, C, H, W)


# ---------------------------------------------------------------------------
# Plain-JAX reference for the correctness check
# ---------------------------------------------------------------------------
def _ref_get_gradient(x):
    xpad = jnp.pad(x, ((0, 0), (0, 0), (1, 1), (1, 1)))
    v = xpad[:, :, 2:, 1:-1] - xpad[:, :, :-2, 1:-1]
    h = xpad[:, :, 1:-1, 2:] - xpad[:, :, 1:-1, :-2]
    return jnp.sqrt(v * v + h * h + 1e-6)


if __name__ == "__main__":
    key = jax.random.PRNGKey(0)
    N, C, H, W = 2, 3, 24, 40          # Get_gradient operates on 3 (RGB) channels
    x = jax.random.normal(key, (N, C, H, W), dtype=jnp.float32)

    grad_fn = jax.jit(get_gradient)
    out = jax.block_until_ready(grad_fn(x))

    ref = _ref_get_gradient(x)
    assert out.shape == (N, C, H, W), out.shape
    err = float(jnp.max(jnp.abs(out - ref)))
    assert jnp.allclose(out, ref, atol=1e-5, rtol=1e-5), err

    print("KERNEL_OK")
</pallas_src>

<mosaic_0001>
module attributes {stable_mosaic.version = 11 : i64} {
  func.func @_get_gradient_kernel(%arg0: i32, %arg1: memref<3x24x40xf32, #tpu.memory_space<vmem>>, %arg2: memref<24x24xf32, #tpu.memory_space<vmem>>, %arg3: memref<40x40xf32, #tpu.memory_space<vmem>>, %arg4: memref<3x24x40xf32, #tpu.memory_space<vmem>>) attributes {dimension_semantics = [#tpu.dimension_semantics<parallel>], iteration_bounds = array<i64: 2>, scalar_prefetch = 0 : i64, scratch_operands = 0 : i64, tpu.core_type = #tpu.core_type<tc>, window_params = [{transform_indices = @transform_0, window_bounds = array<i64: 3, 24, 40>}, {pipeline_mode = #tpu.pipeline_mode<synchronous>, transform_indices = @transform_1, window_bounds = array<i64: 24, 24>}, {pipeline_mode = #tpu.pipeline_mode<synchronous>, transform_indices = @transform_2, window_bounds = array<i64: 40, 40>}, {transform_indices = @transform_3, window_bounds = array<i64: 3, 24, 40>}]} {
    %c0 = arith.constant 0 : index
    %c0_0 = arith.constant 0 : index
    %0 = vector.load %arg2[%c0, %c0_0] : memref<24x24xf32, #tpu.memory_space<vmem>>, vector<24x24xf32>
    %c0_1 = arith.constant 0 : index
    %c0_2 = arith.constant 0 : index
    %1 = vector.load %arg3[%c0_1, %c0_2] : memref<40x40xf32, #tpu.memory_space<vmem>>, vector<40x40xf32>
    %c0_3 = arith.constant 0 : index
    %c0_4 = arith.constant 0 : index
    %c0_5 = arith.constant 0 : index
    %2 = vector.load %arg1[%c0_3, %c0_4, %c0_5] : memref<3x24x40xf32, #tpu.memory_space<vmem>>, vector<1x24x40xf32>
    %3 = vector.shape_cast %2 : vector<1x24x40xf32> to vector<24x40xf32>
    %cst = arith.constant dense<0.000000e+00> : vector<24x40xf32>
    %4 = tpu.matmul %0, %3, %cst {dimension_numbers = #tpu.dot_dimension_numbers<[1], [0], [0], [1], [0, 0, 1, 1], [], []>} : vector<24x24xf32>, vector<24x40xf32>, vector<24x40xf32> -> vector<24x40xf32>
    %cst_6 = arith.constant dense<0.000000e+00> : vector<24x40xf32>
    %5 = tpu.matmul %3, %1, %cst_6 {dimension_numbers = #tpu.dot_dimension_numbers<[1], [0], [0], [1], [0, 0, 1, 1], [], []>} : vector<24x40xf32>, vector<40x40xf32>, vector<24x40xf32> -> vector<24x40xf32>
    %6 = arith.mulf %4, %4 : vector<24x40xf32>
    %7 = arith.mulf %5, %5 : vector<24x40xf32>
    %8 = arith.addf %6, %7 : vector<24x40xf32>
    %cst_7 = arith.constant 9.99999997E-7 : f32
    %9 = vector.broadcast %cst_7 : f32 to vector<24x40xf32>
    %10 = arith.addf %8, %9 : vector<24x40xf32>
    %11 = math.sqrt %10 : vector<24x40xf32>
    %c0_8 = arith.constant 0 : index
    %c0_9 = arith.constant 0 : index
    %c0_10 = arith.constant 0 : index
    %12 = vector.load %arg4[%c0_8, %c0_9, %c0_10] : memref<3x24x40xf32, #tpu.memory_space<vmem>>, vector<1x24x40xf32>
    %13 = vector.shape_cast %12 : vector<1x24x40xf32> to vector<24x40xf32>
    %14 = vector.shape_cast %11 : vector<24x40xf32> to vector<1x24x40xf32>
    tpu.vector_store %arg4[%c0_8, %c0_9, %c0_10], %14 {strides = array<i32>} : memref<3x24x40xf32, #tpu.memory_space<vmem>>, vector<1x24x40xf32>,
    %c1 = arith.constant 1 : index
    %c0_11 = arith.constant 0 : index
    %c0_12 = arith.constant 0 : index
    %15 = vector.load %arg1[%c1, %c0_11, %c0_12] : memref<3x24x40xf32, #tpu.memory_space<vmem>>, vector<1x24x40xf32>
    %16 = vector.shape_cast %15 : vector<1x24x40xf32> to vector<24x40xf32>
    %cst_13 = arith.constant dense<0.000000e+00> : vector<24x40xf32>
    %17 = tpu.matmul %0, %16, %cst_13 {dimension_numbers = #tpu.dot_dimension_numbers<[1], [0], [0], [1], [0, 0, 1, 1], [], []>} : vector<24x24xf32>, vector<24x40xf32>, vector<24x40xf32> -> vector<24x40xf32>
    %cst_14 = arith.constant dense<0.000000e+00> : vector<24x40xf32>
    %18 = tpu.matmul %16, %1, %cst_14 {dimension_numbers = #tpu.dot_dimension_numbers<[1], [0], [0], [1], [0, 0, 1, 1], [], []>} : vector<24x40xf32>, vector<40x40xf32>, vector<24x40xf32> -> vector<24x40xf32>
    %19 = arith.mulf %17, %17 : vector<24x40xf32>
    %20 = arith.mulf %18, %18 : vector<24x40xf32>
    %21 = arith.addf %19, %20 : vector<24x40xf32>
    %cst_15 = arith.constant 9.99999997E-7 : f32
    %22 = vector.broadcast %cst_15 : f32 to vector<24x40xf32>
    %23 = arith.addf %21, %22 : vector<24x40xf32>
    %24 = math.sqrt %23 : vector<24x40xf32>
    %c1_16 = arith.constant 1 : index
    %c0_17 = arith.constant 0 : index
    %c0_18 = arith.constant 0 : index
    %25 = vector.load %arg4[%c1_16, %c0_17, %c0_18] : memref<3x24x40xf32, #tpu.memory_space<vmem>>, vector<1x24x40xf32>
    %26 = vector.shape_cast %25 : vector<1x24x40xf32> to vector<24x40xf32>
    %27 = vector.shape_cast %24 : vector<24x40xf32> to vector<1x24x40xf32>
    tpu.vector_store %arg4[%c1_16, %c0_17, %c0_18], %27 {strides = array<i32>} : memref<3x24x40xf32, #tpu.memory_space<vmem>>, vector<1x24x40xf32>,
    %c2 = arith.constant 2 : index
    %c0_19 = arith.constant 0 : index
    %c0_20 = arith.constant 0 : index
    %28 = vector.load %arg1[%c2, %c0_19, %c0_20] : memref<3x24x40xf32, #tpu.memory_space<vmem>>, vector<1x24x40xf32>
    %29 = vector.shape_cast %28 : vector<1x24x40xf32> to vector<24x40xf32>
    %cst_21 = arith.constant dense<0.000000e+00> : vector<24x40xf32>
    %30 = tpu.matmul %0, %29, %cst_21 {dimension_numbers = #tpu.dot_dimension_numbers<[1], [0], [0], [1], [0, 0, 1, 1], [], []>} : vector<24x24xf32>, vector<24x40xf32>, vector<24x40xf32> -> vector<24x40xf32>
    %cst_22 = arith.constant dense<0.000000e+00> : vector<24x40xf32>
    %31 = tpu.matmul %29, %1, %cst_22 {dimension_numbers = #tpu.dot_dimension_numbers<[1], [0], [0], [1], [0, 0, 1, 1], [], []>} : vector<24x40xf32>, vector<40x40xf32>, vector<24x40xf32> -> vector<24x40xf32>
    %32 = arith.mulf %30, %30 : vector<24x40xf32>
    %33 = arith.mulf %31, %31 : vector<24x40xf32>
    %34 = arith.addf %32, %33 : vector<24x40xf32>
    %cst_23 = arith.constant 9.99999997E-7 : f32
    %35 = vector.broadcast %cst_23 : f32 to vector<24x40xf32>
    %36 = arith.addf %34, %35 : vector<24x40xf32>
    %37 = math.sqrt %36 : vector<24x40xf32>
    %c2_24 = arith.constant 2 : index
    %c0_25 = arith.constant 0 : index
    %c0_26 = arith.constant 0 : index
    %38 = vector.load %arg4[%c2_24, %c0_25, %c0_26] : memref<3x24x40xf32, #tpu.memory_space<vmem>>, vector<1x24x40xf32>
    %39 = vector.shape_cast %38 : vector<1x24x40xf32> to vector<24x40xf32>
    %40 = vector.shape_cast %37 : vector<24x40xf32> to vector<1x24x40xf32>
    tpu.vector_store %arg4[%c2_24, %c0_25, %c0_26], %40 {strides = array<i32>} : memref<3x24x40xf32, #tpu.memory_space<vmem>>, vector<1x24x40xf32>,
    return
  }
  func.func @transform_0(%arg0: i32) -> (i32, i32, i32) {
    %c0_i32 = arith.constant 0 : i32
    %c0_i32_0 = arith.constant 0 : i32
    %c0_i32_1 = arith.constant 0 : i32
    return %arg0, %c0_i32, %c0_i32_0 : i32, i32, i32
  }
  func.func @transform_1(%arg0: i32) -> (i32, i32) {
    %c0_i32 = arith.constant 0 : i32
    %c0_i32_0 = arith.constant 0 : i32
    %c0_i32_1 = arith.constant 0 : i32
    return %c0_i32, %c0_i32_0 : i32, i32
  }
  func.func @transform_2(%arg0: i32) -> (i32, i32) {
    %c0_i32 = arith.constant 0 : i32
    %c0_i32_0 = arith.constant 0 : i32
    %c0_i32_1 = arith.constant 0 : i32
    return %c0_i32, %c0_i32_0 : i32, i32
  }
  func.func @transform_3(%arg0: i32) -> (i32, i32, i32) {
    %c0_i32 = arith.constant 0 : i32
    %c0_i32_0 = arith.constant 0 : i32
    %c0_i32_1 = arith.constant 0 : i32
    return %arg0, %c0_i32, %c0_i32_0 : i32, i32, i32
  }
}

</mosaic_0001>

<bundles_post_ra>
// kernel: get_gradient.1
= control target key start
LH: loop header
LB: loop body
LE: loop exit
PB: predicated region body
PF: predicated region fallthrough
CT: control target
= control target key end

     0   :  { %8 = vsyncpa [#allocation3], 0  ;;  %s1839_s0 = inlined_call_operand.hbm [shape: f32[6,24,40], index: 0, kind: input, shape index: {}]   ;;  %s1840_s1 = inlined_call_operand.hbm [shape: f32[24,24], index: 1, kind: input, shape index: {}]   ;;  %s1841_s2 = inlined_call_operand.hbm [shape: f32[40,40], index: 2, kind: input, shape index: {}]   ;;  %s1842_s3 = inlined_call_operand.hbm [shape: f32[6,24,40], index: 3, kind: output, shape index: {}]  }
   0x1   :  { %10 = vsyncpa [#allocation3 + $0x1], 0 }
   0x2   :  { %11 = vsyncpa [#allocation6], 0 }
   0x3   :  { %12 = vsyncpa [#allocation4], 0 }
   0x4   :  { %14 = vsyncpa [#allocation4 + $0x1], 0  ;;  %s1475_s12 = smov 0   ;;  %s1477_s13 = smov 0  }
   0x5   :  { %s1479_s14 = smov 0   ;;  %s1481_s15 = smov 0  }
   0x6 LB: > { %s1496_s16 = sadd.s32 4294967295, %s1442_s15   ;;  %s975_s17 = sadd.s32 4294967294, %s1442_s15   ;;  %s1442_s15 = sphi %s1481_s15, %s1862_s15   ;;  %s1438_s14 = sphi %s1479_s14, %s1861_s14   ;;  %s1434_s13 = sphi %s1477_s13, %s1860_s13   ;;  %s1430_s12 = sphi %s1475_s12, %s1859_s12  }
   0x7   : > { %p40_p0 = scmp.ne.s32.totalorder %s1434_s13, %s1430_s12  ;;  %p1843_p1 = scmp.eq.s32.totalorder %s1496_s16, 0 }
   0x8   : > { %p112_p3 = scmp.eq.s32.totalorder %s975_s17, 1  ;;  %p976_p5 = scmp.ge.s32.totalorder %s1442_s15, 1 }
   0x9   : > { %p1505_p4 = por %p1843_p1, %p40_p0  ;;  %p119_p7 = scmp.lt.s32.totalorder %s1442_s15, 3 }
   0xa   : > { %p1510_p6 = por %p112_p3, %p40_p0  ;;  %s1444_s21 = smov [#allocation5]  }
   0xb   : > { %s1846_s18 = scalar_select %p1505_p4, 1, 0 }
   0xc   : > { %s1847_s19 = scalar_select %p1510_p6, 1, 0 }
   0xd   : > { %p1515_p8 = pnand %p976_p5, %p119_p7  ;;  %s131_s22 = sshll.u32 %s1444_s21, 4  ;;  %s1519_s22 = int_to_ptr.vmem [resolvable:$true] %s131_s22 }
   0xe   : > { %s1445_s24 = smov [#allocation7]   ;;  %s1286_s28 = scalar_lea.hbm %s1840_s1, 384 }
   0xf   : > { %p1204_p9 = pneg %p1515_p8  ;;  %s144_s25 = sshll.u32 %s1445_s24, 4  ;;  %s1530_s25 = int_to_ptr.vmem [resolvable:$true] %s144_s25 }
  0x10   : > { %p1287_p12 = scmp.ne.s32.totalorder %s1840_s1, %s1286_s28  ;;  %p1293_p5 = scmp.lt.u32.totalorder %s1286_s28, %s1840_s1 }
  0x11   : > { %p1526_p11 = pnand %p1204_p9, %p1843_p1 }
  0x13   : > { %p1288_p13 = pneg %p1526_p11 }
  0x15   : > { %p1289_p0 = pnand %p1288_p13, %p1287_p12 }
  0x17   : > { %p1290_p3 = pneg %p1289_p0 }
  0x19   : > { %p1295_p7 = pnand %p1293_p5, %p1290_p3 }
  0x1b   : > { %1298 = shalt.err (!%p1295_p7)
}
  0x1c   : > { %s1299_s6 = scalar_lea.vmem %s1519_s22, 384  ;;  %p1307_p2 = scmp.lt.s32.totalorder %s1519_s22, %s1519_s22 }
  0x1d   : > { %p1300_p9 = scmp.ne.s32.totalorder %s1519_s22, %s1299_s6  ;;  %p1308_p12 = scmp.lt.s32.totalorder %s1299_s6, %s1299_s6 }
  0x1f   : > { %p1302_p10 = pnand %p1300_p9, %p1288_p13  ;;  %p1309_p0 = por %p1308_p12, %p1307_p2 }
  0x21   : > { %p1303_p1 = pneg %p1302_p10 }
  0x23   : > { %p1310_p6 = pnand %p1309_p0, %p1303_p1 }
  0x25   : > { %1313 = shalt.err (!%p1310_p6)
}
  0x26   : > { %s1446_s7 = smov 128   ;;  %s1447_s8 = smov 8  }
  0x27   : > { %1207 = dma.hbm_to_vmem [thread:$0]  (!%p1526_p11), %s1840_s1, 384, %s1519_s22, [#allocation6], %s1446_s7, %s1446_s7, %s1447_s8  }
  0x28   : > { %s1314_s21 = scalar_lea.hbm %s1841_s2, 640 }
  0x29   : > { %p1315_p1 = scmp.ne.s32.totalorder %s1841_s2, %s1314_s21  ;;  %p1321_p10 = scmp.lt.u32.totalorder %s1314_s21, %s1841_s2 }
  0x2b   : > { %p1317_p2 = pnand %p1315_p1, %p1288_p13 }
  0x2d   : > { %p1318_p6 = pneg %p1317_p2 }
  0x2f   : > { %p1323_p3 = pnand %p1321_p10, %p1318_p6 }
  0x31   : > { %1326 = shalt.err (!%p1323_p3)
}
  0x32   : > { %s1327_s22 = scalar_lea.vmem %s1530_s25, 640  ;;  %p1335_p12 = scmp.lt.s32.totalorder %s1530_s25, %s1530_s25 }
  0x33   : > { %p1328_p5 = scmp.ne.s32.totalorder %s1530_s25, %s1327_s22  ;;  %p1336_p0 = scmp.lt.s32.totalorder %s1327_s22, %s1327_s22 }
  0x35   : > { %p1330_p7 = pnand %p1328_p5, %p1288_p13  ;;  %p1337_p1 = por %p1336_p0, %p1335_p12 }
  0x37   : > { %p1331_p9 = pneg %p1330_p7 }
  0x39   : > { %p1338_p2 = pnand %p1337_p1, %p1331_p9 }
  0x3b   : > { %1341 = shalt.err (!%p1338_p2)
}
  0x3c   : > { %1210 = dma.hbm_to_vmem [thread:$0]  (!%p1526_p11), %s1841_s2, 640, %s1530_s25, [#allocation6], %s1446_s7, %s1446_s7, %s1447_s8  }
  0x3d   : > { %s1591_s23 = sadd.s32 1, %s1442_s15   ;;  %s27_s5 = sadd.s32 1, %s1438_s14 }
  0x3e   : > { %s24_s4 = ssub.s32 %s1442_s15, %s1591_s23  ;;  %p34_p6 = scmp.ne.s32.totalorder %s1438_s14, %s1434_s13 }
  0x3f   : > { %p25_p13 = scmp.eq.s32.totalorder %s24_s4, 0  ;;  %p35_p10 = scmp.eq.s32.totalorder %s1442_s15, 0 }
  0x40   : > { %p1221_p3 = scmp.lt.s32.totalorder %s1442_s15, 2  ;;  %p1850_p7 = scmp.eq.s32.totalorder %s1496_s16, 1 }
  0x41   : > { %s1601_s6 = scalar_select %p25_p13, %s1438_s14, %s27_s5  }
  0x42   : > { %p36_p5 = por %p35_p10, %p34_p6  ;;  %p1605_p9 = por %p1850_p7, %p34_p6 }
  0x43   : > { %s158_s10 = sand.u32 1, %s1438_s14   ;;  %s1222_s11 = smul.u32 1152, %s1442_s15 }
  0x44   : > { %s1851_s9 = scalar_select %p1605_p9, 1, 0 }
  0x45   : > { %s1188_s25 = smul.u32 72, %s158_s10  ;;  %p1611_p11 = pnand %p1221_p3, %p36_p5 }
  0x46   : > { %s1618_s26 = scalar_lea.hbm %s1839_s0, %s1222_s11  ;;  %s1622_s22 = scalar_lea.sflag [#allocation3], %s158_s10 }
  0x47   : > { %s162_s27 = scalar_lea.vmem [#allocation2], %s1188_s25  ;;  %s1342_s29 = scalar_lea.hbm %s1618_s26, 1152 }
  0x48   : > { %s170_s28 = sshll.u32 %s162_s27, 4  ;;  %p1343_p12 = scmp.ne.s32.totalorder %s1618_s26, %s1342_s29  ;;  %s1620_s28 = int_to_ptr.vmem [resolvable:$true] %s170_s28 }
  0x49   : > { %p1344_p0 = pneg %p1611_p11  ;;  %s1347_s5 = scalar_lea.hbm %s1839_s0, 2304 }
  0x4a   : > { %p1348_p13 = scmp.lt.u32.totalorder %s1618_s26, %s1839_s0  ;;  %p1349_p6 = scmp.lt.u32.totalorder %s1347_s5, %s1342_s29 }
  0x4b   : > { %p1345_p1 = pnand %p1344_p0, %p1343_p12  ;;  %p1351_p3 = scmp.lt.u32.totalorder %s1342_s29, %s1618_s26 }
  0x4c   : > { %p1350_p10 = por %p1349_p6, %p1348_p13 }
  0x4d   : > { %p1346_p2 = pneg %p1345_p1 }
  0x4e   : > { %p1352_p5 = por %p1351_p3, %p1350_p10 }
  0x50   : > { %p1353_p7 = pnand %p1352_p5, %p1346_p2 }
  0x52   : > { %1356 = shalt.err (!%p1353_p7)
}
  0x53   : > { %s1357_s10 = scalar_lea.vmem %s1620_s28, 1152  ;;  %s1448_s25 = smov [#allocation2]  }
  0x54   : > { %p1358_p12 = scmp.ne.s32.totalorder %s1620_s28, %s1357_s10  ;;  %s1362_s24 = sshll.u32 %s1448_s25, 4  ;;  %s1363_s24 = int_to_ptr.vmem [resolvable:$false] %s1362_s24 }
  0x55   : > { %s1364_s27 = scalar_lea.vmem %s1363_s24, 2304  ;;  %p1365_p4 = scmp.lt.s32.totalorder %s1620_s28, %s1363_s24 }
  0x56   : > { %p1360_p1 = pnand %p1358_p12, %p1344_p0  ;;  %p1366_p13 = scmp.lt.s32.totalorder %s1364_s27, %s1357_s10 }
  0x58   : > { %p1361_p9 = pneg %p1360_p1  ;;  %p1367_p6 = por %p1366_p13, %p1365_p4 }
  0x5a   : > { %p1368_p10 = pnand %p1367_p6, %p1361_p9 }
  0x5c   : > { %1371 = shalt.err (!%p1368_p10)
}
  0x5d   : > { %1214 = dma.hbm_to_vmem [thread:$0]  (!%p1611_p11), %s1618_s26, 1152, %s1620_s28, %s1622_s22, %s1446_s7, %s1446_s7, %s1447_s8  }
  0x5e   : > { %182 = sbr.rel (%p1515_p8) target bundleno = 397 (0x18d), region = 32  ;;  %s1656_s29 = sand.u32 (!%p1515_p8), 1, %s1434_s13  }
  0x5f   : > { %s1190_s30 = smul.u32 (!%p1515_p8), 72, %s1656_s29  ;;  %s185_s4 = scalar_lea.sflag (!%p1515_p8), [#allocation3], %s1656_s29 }
  0x60   : > { %p1853_p4 = scmp.ne.s32.totalorder (!%p1515_p8), %s1846_s18, 0 }
  0x61   : > { %s1662_s17 = scalar_lea.vmem (!%p1515_p8), [#allocation2], %s1190_s30 }
  0x65   : > { %1417 = dma.done.wait (%p1853_p4), %s185_s4, 1152  }
  0x66   : > { %1419 = vsyncadd (%p1853_p4), %s185_s4, 4294966144  ;;  %p1854_p9 = scmp.eq.s32.totalorder %s1496_s16, 0 }
  0x68   : > { %1421 = dma.done.wait (%p1854_p9), [#allocation6], 1024   ;;  %p1855_p8 = pmov %p1854_p9 }
  0x69   : > { %v1449_v0 = vmov 0.0|0.0   ;;  %vm1450_vm0 = vmmov 0   ;;  %v1451_v1 = vmov 0.0   ;;  %v224_v2 = vld [vmem:[#allocation7] sm:$0xff]  ;;  %v225_v3 = vld [vmem:[#allocation7 + $0x8] sm:$0xff]  ;;  %v226_v7 = vld [vmem:[#allocation7 + $0x10] sm:$0xff] }
  0x6a   : > { %1423 = vsyncadd (%p1855_p8), [#allocation6], 4294966272  ;;  %1164 = vmatprep.subr.bf16.mxu1 %v1449_v0  ;;  %1161 = vmatprep.subr.bf16.mxu0 %v1449_v0  ;;  %v229_v4 = vld [vmem:[%s1662_s17] sm:$0xff]  ;;  %v1165_v5 = vpack.c.bf16 %v225_v3, %v224_v2  ;;  %v230_v6 = vld [vmem:[%s1662_s17 + $0x8] sm:$0xff]  ;;  %vm232_vm1 = vcmask 195584   ;;  %vm322_vm2 = vcmask 326656  }
  0x6b   : > { %1065 = vmatprep.mubr.msk.f32.mxu0 %vm1450_vm0, %v1451_v1  ;;  %1084 = vmatprep.mubr.msk.f32.mxu1 %vm1450_vm0, %v1451_v1  ;;  %v227_v8 = vld [vmem:[#allocation7 + $0x18] sm:$0xff]  ;;  %v1162_v9 = vpack.c.bf16 %v230_v6, %v229_v4  ;;  %v231_v13 = vld [vmem:[%s1662_s17 + $0x10] sm:$0xff]  ;;  %v228_v16 = vld [vmem:[#allocation7 + $0x20] sm:$0xff]  ;;  %s1757_s18 = scalar_lea.vmem [#allocation8], %s1190_s30  ;;  %s1225_s20 = smul.u32 1152, %s1496_s16 }
  0x6c   : > { %1166 = vmatpush3.bf16.msra.mxu1 %v1165_v5  ;;  %v1168_v10 = vpack.c.bf16 %v227_v8, %v226_v7  ;;  %v990_v11 = vld [vmem:[%s1662_s17 + $0x18] sm:$0xff]  ;;  %v991_v12 = vld [vmem:[%s1662_s17 + $0x20] sm:$0xff]  ;;  %v221_v14 = vld [vmem:[#allocation5] sm:$0xff]  ;;  %s883_s7 = sshll.u32 %s1757_s18, 4  ;;  %s869_s16 = scalar_lea.sflag [#allocation4], %s1656_s29  ;;  %s1793_s7 = int_to_ptr.vmem [resolvable:$true] %s883_s7 }
  0x6d   : > { %1167 = vmatprep.subr.bf16.mxu1 %v1449_v0  ;;  %1163 = vmatpush3.bf16.msra.mxu0 %v1162_v9  ;;  %v1171_v15 = vpack.c.bf16 %v991_v12, %v990_v11  ;;  %v222_v17 = vld [vmem:[#allocation5 + $0x8] sm:$0xff]  ;;  %v992_v18 = vld [vmem:[%s1662_s17 + $0x28] sm:$0xff]  ;;  %v223_v19 = vld [vmem:[#allocation5 + $0x10] sm:$0xff]  ;;  %s1791_s28 = scalar_lea.hbm %s1842_s3, %s1225_s20  ;;  %s1372_s22 = scalar_lea.vmem %s1793_s7, 1152 }
  0x6e   : > { %1063 = vmatprep.subr.mxu0 %v1451_v1  ;;  %v1002_v20 = vld [vmem:[%s1662_s17 + $0x30] sm:$0xff]  ;;  %v1003_v21 = vld [vmem:[%s1662_s17 + $0x38] sm:$0xff]  ;;  %v1004_v23 = vld [vmem:[%s1662_s17 + $0x40] sm:$0xff]  ;;  %p1373_p11 = scmp.ne.s32.totalorder %s1793_s7, %s1372_s22  ;;  %p1856_p0 = scmp.ne.s32.totalorder %s1851_s9, 0 }
  0x6f   : > { %v1180_v22 = vpack.c.bf16 %v1003_v21, %v1002_v20  ;;  %s1452_s5 = smov [#allocation8]  }
  0x70   : > { %1169 = vmatpush3.bf16.msra.mxu1 %v1168_v10  ;;  %p1374_p2 = pnand %p1373_p11, %p1856_p0  ;;  %s1376_s11 = sshll.u32 %s1452_s5, 4  ;;  %s1377_s11 = int_to_ptr.vmem [resolvable:$false] %s1376_s11 }
  0x71   : > { %1082 = vmatprep.subr.mxu1 %v1451_v1  ;;  %1064 = vmatpush3.msra.mxu0 %v231_v13  ;;  %s1378_s21 = scalar_lea.vmem %s1377_s11, 2304  ;;  %p1379_p5 = scmp.lt.s32.totalorder %s1793_s7, %s1377_s11 }
  0x72   : > { %1066 = vmatmul.mubr.msk.f32.vlgmr.msra.gmra.mrb[0].mxu0 %vm232_vm1, %v221_v14  ;;  %1170 = vmatprep.subr.bf16.mxu0 %v1449_v0  ;;  %p1375_p3 = pneg %p1374_p2  ;;  %p1380_p7 = scmp.lt.s32.totalorder %s1378_s21, %s1372_s22 }
  0x73   : > { %1172 = vmatpush3.bf16.msra.mxu0 %v1171_v15  ;;  %1068 = vmatprep.mubr.msk.f32.mxu0 %vm1450_vm0, %v1451_v1 }
  0x74   : > { %1083 = vmatpush3.msra.mxu1 %v228_v16  ;;  %1097 = vmatprep.subr.mxu0 %v1451_v1  ;;  %p1381_p12 = por %p1380_p7, %p1379_p5 }
  0x75   : > { %1085 = vmatmul.mubr.msk.f32.vlgmr.msra.gmra.mrb[0].mxu1 %vm322_vm2, %v229_v4  ;;  %1173 = vmatprep.subr.bf16.mxu1 %v1449_v0 }
  0x76   : > { %1175 = vmatpush3.bf16.msra.mxu1 %v1165_v5  ;;  %1087 = vmatprep.mubr.msk.f32.mxu1 %vm1450_vm0, %v1451_v1  ;;  %p1382_p1 = pnand %p1381_p12, %p1375_p3 }
  0x77   : > { %1069 = vmatmul.mubr.msk.f32.gmra.mrb[2].mxu0 %vm232_vm1, %v222_v17  ;;  %1176 = vmatprep.subr.bf16.mxu1 %v1449_v0 }
  0x78   : > { %1071 = vmatprep.mubr.msk.f32.mxu0 %vm1450_vm0, %v1451_v1  ;;  %1098 = vmatpush3.msra.mxu0 %v992_v18 }
  0x79   : > { %1088 = vmatmul.mubr.msk.f32.gmra.mrb[2].mxu1 %vm322_vm2, %v230_v6  ;;  %1179 = vmatprep.subr.bf16.mxu0 %v1449_v0 }
  0x7a   : > { %1178 = vmatpush3.bf16.msra.mxu1 %v1168_v10  ;;  %1090 = vmatprep.mubr.msk.f32.mxu1 %vm1450_vm0, %v1451_v1 }
  0x7b   : > { %1072 = vmatmul.mubr.msk.f32.gmra.mrb[4].mxu0 %vm232_vm1, %v223_v19  ;;  %1116 = vmatprep.subr.mxu1 %v1451_v1 }
  0x7c   : > { %1099 = vmatprep.mubr.msk.f32.mxu0 %vm1450_vm0, %v1451_v1 }
  0x7d   : > { %1091 = vmatmul.mubr.msk.f32.gmra.mrb[4].mxu1 %vm322_vm2, %v231_v13 }
  0x7e   : > { %1117 = vmatpush3.msra.mxu1 %v228_v16  ;;  %1118 = vmatprep.mubr.msk.f32.mxu1 %vm1450_vm0, %v1451_v1 }
  0x7f   : > { %1100 = vmatmul.mubr.msk.f32.vlgmr.msra.gmra.mrb[6].mxu0 %vm232_vm1, %v221_v14  ;;  %1182 = vmatprep.subr.bf16.mxu1 %v1449_v0 }
  0x80   : > { %1181 = vmatpush3.bf16.msra.mxu0 %v1180_v22  ;;  %1102 = vmatprep.mubr.msk.f32.mxu0 %vm1450_vm0, %v1451_v1 }
  0x81   : > { %1119 = vmatmul.mubr.msk.f32.vlgmr.msra.gmra.mrb[6].mxu1 %vm322_vm2, %v990_v11  ;;  %1131 = vmatprep.subr.mxu0 %v1451_v1 }
  0x82   : > { %1184 = vmatpush3.bf16.msra.mxu1 %v1165_v5  ;;  %1121 = vmatprep.mubr.msk.f32.mxu1 %vm1450_vm0, %v1451_v1 }
  0x83   : > { %1103 = vmatmul.mubr.msk.f32.gmra.mrb[8].mxu0 %vm232_vm1, %v222_v17  ;;  %1185 = vmatprep.subr.bf16.mxu1 %v1449_v0 }
  0x84   : > { %1105 = vmatprep.mubr.msk.f32.mxu0 %vm1450_vm0, %v1451_v1  ;;  %1132 = vmatpush3.msra.mxu0 %v1004_v23 }
  0x85   : > { %1122 = vmatmul.mubr.msk.f32.gmra.mrb[8].mxu1 %vm322_vm2, %v991_v12 }
  0x86   : > { %1187 = vmatpush3.bf16.msra.mxu1 %v1168_v10  ;;  %1124 = vmatprep.mubr.msk.f32.mxu1 %vm1450_vm0, %v1451_v1 }
  0x87   : > { %1106 = vmatmul.mubr.msk.f32.gmra.mrb[10].mxu0 %vm232_vm1, %v223_v19  ;;  %1150 = vmatprep.subr.mxu1 %v1451_v1 }
  0x88   : > { %1133 = vmatprep.mubr.msk.f32.mxu0 %vm1450_vm0, %v1451_v1 }
  0x89   : > { %1125 = vmatmul.mubr.msk.f32.gmra.mrb[10].mxu1 %vm322_vm2, %v992_v18 }
  0x8a   : > { %1151 = vmatpush3.msra.mxu1 %v228_v16  ;;  %1152 = vmatprep.mubr.msk.f32.mxu1 %vm1450_vm0, %v1451_v1 }
  0x8b   : > { %1134 = vmatmul.mubr.msk.f32.vlgmr.msra.gmra.mrb[12].mxu0 %vm232_vm1, %v221_v14 }
  0x8c   : > { %1136 = vmatprep.mubr.msk.f32.mxu0 %vm1450_vm0, %v1451_v1 }
  0x8d   : > { %1153 = vmatmul.mubr.msk.f32.vlgmr.msra.gmra.mrb[12].mxu1 %vm322_vm2, %v1002_v20 }
  0x8e   : > { %1155 = vmatprep.mubr.msk.f32.mxu1 %vm1450_vm0, %v1451_v1 }
  0x8f   : > { %1137 = vmatmul.mubr.msk.f32.gmra.mrb[14].mxu0 %vm232_vm1, %v222_v17 }
  0x90   : > { %1139 = vmatprep.mubr.msk.f32.mxu0 %vm1450_vm0, %v1451_v1 }
  0x91   : > { %1156 = vmatmul.mubr.msk.f32.gmra.mrb[14].mxu1 %vm322_vm2, %v1003_v21 }
  0x92   : > { %1158 = vmatprep.mubr.msk.f32.mxu1 %vm1450_vm0, %v1451_v1 }
  0x93   : > { %1140 = vmatmul.mubr.msk.f32.gmra.mrb[16].mxu0 %vm232_vm1, %v223_v19 }
  0x95   : > { %1159 = vmatmul.mubr.msk.f32.gmra.mrb[16].mxu1 %vm322_vm2, %v1004_v23 }
 0x145   : > { %v308_v24 = vpop.f32.mrb[0].mxu0 }
 0x146   : > { %v1067_v25 = vpop.f32.mrb[1].mxu0  ;;  %v412_v26 = vmul.f32 %v308_v24, %v308_v24 }
 0x148   : > { %v398_v27 = vpop.f32.mrb[0].mxu1 }
 0x149   : > { %v415_v28 = vmul.f32 %v398_v27, %v398_v27  ;;  %v1086_v29 = vpop.f32.mrb[1].mxu1 }
 0x14a   : > { %v313_v30 = vpop.f32.mrb[2].mxu0 }
 0x14b   : > { %v418_v31 = vadd.f32 %v415_v28, %v412_v26  ;;  %v1070_v32 = vpop.f32.mrb[3].mxu0  ;;  %v413_v33 = vmul.f32 %v313_v30, %v313_v30 }
 0x14c   : > { %v403_v34 = vpop.f32.mrb[2].mxu1 }
 0x14d   : > { %v421_v35 = vadd.f32 1e-06, %v418_v31  ;;  %v416_v36 = vmul.f32 %v403_v34, %v403_v34  ;;  %v1089_v37 = vpop.f32.mrb[3].mxu1 }
 0x14e   : > { %v318_v38 = vpop.f32.mrb[4].mxu0 }
 0x14f   : > { %1268 = vrsqrt.f32 %v421_v35  ;;  %v1073_v39 = vpop.f32.mrb[5].mxu0  ;;  %v419_v40 = vadd.f32 %v416_v36, %v413_v33  ;;  %v414_v41 = vmul.f32 %v318_v38, %v318_v38  ;;  %vm426_vm3 = vcmp.eq.f32.partialorder %v421_v35, inf }
 0x150   : > { %v408_v42 = vpop.f32.mrb[4].mxu1  ;;  %v429_v1 = vand.u32 2147483648, %v421_v35  ;;  %vm428_vm4 = vcmp.eq.f32.partialorder %v421_v35, 0.0 }
 0x151   : > { %v417_v43 = vmul.f32 %v408_v42, %v408_v42  ;;  %v1092_v44 = vpop.f32.mrb[5].mxu1  ;;  %v422_v45 = vadd.f32 1e-06, %v419_v40 }
 0x152   : > { %v518_v46 = vpop.f32.mrb[6].mxu0 }
 0x153   : > { %v420_v47 = vadd.f32 %v417_v43, %v414_v41  ;;  %v1101_v48 = vpop.f32.mrb[7].mxu0  ;;  %1270 = vrsqrt.f32 %v422_v45  ;;  %v621_v49 = vmul.f32 %v518_v46, %v518_v46  ;;  %vm433_vm5 = vcmp.eq.f32.partialorder %v422_v45, inf }
 0x154   : > { %v607_v50 = vpop.f32.mrb[6].mxu1  ;;  %v436_v15 = vand.u32 2147483648, %v422_v45  ;;  %vm435_vm6 = vcmp.eq.f32.partialorder %v422_v45, 0.0 }
 0x155   : > { %v423_v51 = vadd.f32 1e-06, %v420_v47  ;;  %v624_v52 = vmul.f32 %v607_v50, %v607_v50  ;;  %v1120_v53 = vpop.f32.mrb[7].mxu1 }
 0x156   : > { %v523_v54 = vpop.f32.mrb[8].mxu0 }
 0x157   : > { %1272 = vrsqrt.f32 %v423_v51  ;;  %v1104_v55 = vpop.f32.mrb[9].mxu0  ;;  %v627_v56 = vadd.f32 %v624_v52, %v621_v49  ;;  %v622_v57 = vmul.f32 %v523_v54, %v523_v54  ;;  %vm440_vm7 = vcmp.eq.f32.partialorder %v423_v51, inf }
 0x158   : > { %v612_v58 = vpop.f32.mrb[8].mxu1  ;;  %v443_v27 = vand.u32 2147483648, %v423_v51  ;;  %vm442_vm8 = vcmp.eq.f32.partialorder %v423_v51, 0.0 }
 0x159   : > { %v1269_v59 = vpop.eup %1268  ;;  %v625_v60 = vmul.f32 %v612_v58, %v612_v58  ;;  %v1123_v61 = vpop.f32.mrb[9].mxu1  ;;  %v1750_v63 = vadd.f32 1e-06, %v627_v56 }
 0x15a   : > { %v425_v62 = vmul.f32 %v1269_v59, %v421_v35  ;;  %v528_v0 = vpop.f32.mrb[10].mxu0 }
 0x15b   : > { %v628_v2 = vadd.f32 %v625_v60, %v622_v57  ;;  %v1107_v3 = vpop.f32.mrb[11].mxu0  ;;  %1274 = vrsqrt.f32 %v1750_v63  ;;  %v623_v5 = vmul.f32 %v528_v0, %v528_v0  ;;  %vm635_vm9 = vcmp.eq.f32.partialorder %v1750_v63, inf }
 0x15c   : > { %v427_v4 = vsel %vm426_vm3, %v421_v35, %v425_v62  ;;  %v617_v6 = vpop.f32.mrb[10].mxu1  ;;  %v638_v41 = vand.u32 2147483648, %v1750_v63  ;;  %vm637_vm10 = vcmp.eq.f32.partialorder %v1750_v63, 0.0 }
 0x15d   : > { %v430_v7 = vsel %vm428_vm4, %v429_v1, %v427_v4  ;;  %v1753_v8 = vadd.f32 1e-06, %v628_v2  ;;  %v626_v9 = vmul.f32 %v617_v6, %v617_v6  ;;  %v1126_v10 = vpop.f32.mrb[11].mxu1  ;;  %v1271_v11 = vpop.eup %1270 }
 0x15e   : > { %445 = vst.msk [vmem:[%s1757_s18] sm:$0xff] %vm322_vm2, %v430_v7  ;;  %v728_v12 = vpop.f32.mrb[12].mxu0  ;;  %v432_v13 = vmul.f32 %v1271_v11, %v422_v45 }
 0x15f   : > { %1276 = vrsqrt.f32 %v1753_v8  ;;  %v1135_v14 = vpop.f32.mrb[13].mxu0  ;;  %v629_v16 = vadd.f32 %v626_v9, %v623_v5  ;;  %v831_v17 = vmul.f32 %v728_v12, %v728_v12  ;;  %vm642_vm11 = vcmp.eq.f32.partialorder %v1753_v8, inf }
 0x160   : > { %v817_v18 = vpop.f32.mrb[12].mxu1  ;;  %v434_v20 = vsel %vm433_vm5, %v422_v45, %v432_v13  ;;  %v645_v52 = vand.u32 2147483648, %v1753_v8  ;;  %vm644_vm12 = vcmp.eq.f32.partialorder %v1753_v8, 0.0 }
 0x161   : > { %v1273_v19 = vpop.eup %1272  ;;  %v834_v21 = vmul.f32 %v817_v18, %v817_v18  ;;  %v1154_v22 = vpop.f32.mrb[13].mxu1  ;;  %v437_v23 = vsel %vm435_vm6, %v436_v15, %v434_v20  ;;  %v632_v25 = vadd.f32 1e-06, %v629_v16 }
 0x162   : > { %v439_v24 = vmul.f32 %v1273_v19, %v423_v51  ;;  %v733_v26 = vpop.f32.mrb[14].mxu0  ;;  %446 = vst.msk [vmem:[%s1757_s18 + $0x8] sm:$0xff] %vm322_vm2, %v437_v23 }
 0x163   : > { %v837_v28 = vadd.f32 %v834_v21, %v831_v17  ;;  %v1138_v29 = vpop.f32.mrb[15].mxu0  ;;  %1278 = vrsqrt.f32 %v632_v25  ;;  %v832_v31 = vmul.f32 %v733_v26, %v733_v26  ;;  %vm649_vm13 = vcmp.eq.f32.partialorder %v632_v25, inf }
 0x164   : > { %v441_v30 = vsel %vm440_vm7, %v423_v51, %v439_v24  ;;  %v822_v32 = vpop.f32.mrb[14].mxu1  ;;  %v652_v59 = vand.u32 2147483648, %v632_v25  ;;  %vm651_vm14 = vcmp.eq.f32.partialorder %v632_v25, 0.0 }
 0x165   : > { %v444_v33 = vsel %vm442_vm8, %v443_v27, %v441_v30  ;;  %v840_v34 = vadd.f32 1e-06, %v837_v28  ;;  %v835_v35 = vmul.f32 %v822_v32, %v822_v32  ;;  %v1157_v36 = vpop.f32.mrb[15].mxu1  ;;  %v1275_v37 = vpop.eup %1274 }
 0x166   : > { %447 = vst.msk [vmem:[%s1757_s18 + $0x10] sm:$0xff] %vm322_vm2, %v444_v33  ;;  %v738_v38 = vpop.f32.mrb[16].mxu0  ;;  %v634_v39 = vmul.f32 %v1275_v37, %v1750_v63 }
 0x167   : > { %1280 = vrsqrt.f32 %v840_v34  ;;  %v1141_v40 = vpop.f32.mrb[17].mxu0  ;;  %v838_v42 = vadd.f32 %v835_v35, %v832_v31  ;;  %v833_v43 = vmul.f32 %v738_v38, %v738_v38  ;;  %vm845_vm15 = vcmp.eq.f32.partialorder %v840_v34, inf }
 0x168   : > { %v827_v44 = vpop.f32.mrb[16].mxu1  ;;  %v636_v46 = vsel %vm635_vm9, %v1750_v63, %v634_v39  ;;  %v848_v0 = vand.u32 2147483648, %v840_v34  ;;  %vm847_vm0 = vcmp.eq.f32.partialorder %v840_v34, 0.0 }
 0x169   : > { %v1277_v45 = vpop.eup %1276  ;;  %v836_v47 = vmul.f32 %v827_v44, %v827_v44  ;;  %v1160_v48 = vpop.f32.mrb[17].mxu1  ;;  %v639_v49 = vsel %vm637_vm10, %v638_v41, %v636_v46  ;;  %v841_v51 = vadd.f32 1e-06, %v838_v42 }
 0x16a   : > { %v641_v50 = vmul.f32 %v1277_v45, %v1753_v8  ;;  %999 = vst.msk [vmem:[%s1757_s18 + $0x18] sm:$0xff] %vm322_vm2, %v639_v49 }
 0x16b   : > { %v839_v53 = vadd.f32 %v836_v47, %v833_v43  ;;  %1282 = vrsqrt.f32 %v841_v51  ;;  %vm852_vm1 = vcmp.eq.f32.partialorder %v841_v51, inf  ;;  %v855_v5 = vand.u32 2147483648, %v841_v51 }
 0x16c   : > { %v643_v54 = vsel %vm642_vm11, %v1753_v8, %v641_v50  ;;  %vm854_vm3 = vcmp.eq.f32.partialorder %v841_v51, 0.0 }
 0x16d   : > { %v646_v55 = vsel %vm644_vm12, %v645_v52, %v643_v54  ;;  %v842_v56 = vadd.f32 1e-06, %v839_v53  ;;  %v1279_v57 = vpop.eup %1278 }
 0x16e   : > { %1000 = vst.msk [vmem:[%s1757_s18 + $0x20] sm:$0xff] %vm322_vm2, %v646_v55  ;;  %v648_v58 = vmul.f32 %v1279_v57, %v632_v25 }
 0x16f   : > { %1284 = vrsqrt.f32 %v842_v56  ;;  %vm859_vm4 = vcmp.eq.f32.partialorder %v842_v56, inf  ;;  %v862_v10 = vand.u32 2147483648, %v842_v56  ;;  %vm861_vm5 = vcmp.eq.f32.partialorder %v842_v56, 0.0 }
 0x170   : > { %v650_v61 = vsel %vm649_vm13, %v632_v25, %v648_v58 }
 0x171   : > { %v1281_v60 = vpop.eup %1280  ;;  %v653_v62 = vsel %vm651_vm14, %v652_v59, %v650_v61 }
 0x172   : > { %v844_v63 = vmul.f32 %v1281_v60, %v840_v34  ;;  %1001 = vst.msk [vmem:[%s1757_s18 + $0x28] sm:$0xff] %vm322_vm2, %v653_v62 }
 0x174   : > { %v846_v1 = vsel %vm845_vm15, %v840_v34, %v844_v63 }
 0x175   : > { %v849_v2 = vsel %vm847_vm0, %v848_v0, %v846_v1  ;;  %v1283_v3 = vpop.eup %1282 }
 0x176   : > { %1011 = vst.msk [vmem:[%s1757_s18 + $0x30] sm:$0xff] %vm322_vm2, %v849_v2  ;;  %v851_v4 = vmul.f32 %v1283_v3, %v841_v51 }
 0x178   : > { %v853_v7 = vsel %vm852_vm1, %v841_v51, %v851_v4 }
 0x179   : > { %v1285_v6 = vpop.eup %1284  ;;  %v856_v8 = vsel %vm854_vm3, %v855_v5, %v853_v7 }
 0x17a   : > { %v858_v9 = vmul.f32 %v1285_v6, %v842_v56  ;;  %1012 = vst.msk [vmem:[%s1757_s18 + $0x38] sm:$0xff] %vm322_vm2, %v856_v8 }
 0x17c   : > { %v860_v11 = vsel %vm859_vm4, %v842_v56, %v858_v9 }
 0x17d   : > { %v863_v12 = vsel %vm861_vm5, %v862_v10, %v860_v11 }
 0x17e   : > { %1013 = vst.msk [vmem:[%s1757_s18 + $0x40] sm:$0xff] %vm322_vm2, %v863_v12 }
 0x17f   : > { %1385 = shalt.err (!%p1382_p1)
}
 0x180   : > { %s1386_s10 = scalar_lea.hbm %s1791_s28, 1152  ;;  %s1390_s27 = scalar_lea.hbm %s1842_s3, 2304 }
 0x181   : > { %p1387_p13 = scmp.ne.s32.totalorder %s1791_s28, %s1386_s10  ;;  %p1391_p4 = scmp.lt.u32.totalorder %s1791_s28, %s1842_s3 }
 0x182   : > { %p1392_p9 = scmp.lt.u32.totalorder %s1390_s27, %s1386_s10  ;;  %p1394_p11 = scmp.lt.u32.totalorder %s1386_s10, %s1791_s28 }
 0x183   : > { %p1388_p6 = pnand %p1387_p13, %p1856_p0 }
 0x184   : > { %p1393_p8 = por %p1392_p9, %p1391_p4 }
 0x185   : > { %p1389_p10 = pneg %p1388_p6 }
 0x186   : > { %p1395_p2 = por %p1394_p11, %p1393_p8 }
 0x188   : > { %p1396_p3 = pnand %p1395_p2, %p1389_p10 }
 0x18a   : > { %1399 = shalt.err (!%p1396_p3)
}
 0x18b   : > { %s1453_s17 = smov 128   ;;  %s1454_s18 = smov 8  }
 0x18c   : > { %1202 = dma.vmem_to_hbm [thread:$0]  (%p1856_p0), %s1793_s7, 1152, %s1791_s28, %s869_s16, %s1453_s17, %s1453_s17, %s1454_s18  }
 0x18d PF: > { %s898_s20 = sand.u32 1, %s1430_s12   ;;  %p1857_p5 = scmp.ne.s32.totalorder %s1847_s19, 0 }
 0x18e   : > { %p1858_p7 = scmp.ge.s32.totalorder %s1442_s15, 2  ;;  %s899_s8 = scalar_lea.sflag [#allocation4], %s898_s20 }
 0x190   : > { %p1216_p12 = pnand %p1858_p7, %p1857_p5 }
 0x192   : > { %1425 = dma.done.wait (!%p1216_p12), %s899_s8, 1152  }
 0x193   : > { %1427 = vsyncadd (!%p1216_p12), %s899_s8, 4294966144  ;;  %p17_p1 = scmp.ge.s32.totalorder %s1591_s23, 4   ;;  %s1859_s12 = smov %s1434_s13 }
 0x194   : > { %s1860_s13 = smov %s1438_s14  ;;  %s1861_s14 = smov %s1601_s6 }
 0x195   : > { %s1862_s15 = smov %s1591_s23  ;;  %19 = sbr.rel (!%p17_p1) target bundleno = 6 (0x6), region = 89 }
 0x19c   :  { %904 = vsyncpa [#allocation3], 1 }
 0x19d   :  { %906 = vsyncpa [#allocation3 + $0x1], 1 }
 0x19e   :  { %907 = vsyncpa [#allocation6], 1 }
 0x19f   :  { %908 = vsyncpa [#allocation4], 1 }
 0x1a0   :  { %910 = vsyncpa [#allocation4 + $0x1], 1 }

</bundles_post_ra>
